<compile_context>
chip_gen: v6e
topology: v6e:2x2x1
jax: 0.10.0
libtpu: 0.0.40
codegen_flags: <defaults>
</compile_context>

<pallas_src>
import functools

import jax
import jax.numpy as jnp
from jax.experimental import pallas as pl
from jax.experimental.pallas import tpu as pltpu


# ----------------------------- Pallas kernel --------------------------------

def _mlp_fused_kernel(*refs, num_layers: int, has_xj: bool, compute_dtype):
    """refs = [x, (x_j), w0, b0, w1, b1, ..., w_{L-1}, b_{L-1}, out]."""
    idx = 0
    x_ref = refs[idx]; idx += 1
    xj_ref = None
    if has_xj:
        xj_ref = refs[idx]; idx += 1
    wb_refs = refs[idx: idx + 2 * num_layers]
    o_ref = refs[idx + 2 * num_layers]

    # Optional elementwise multiply fused into the first layer's input (VPU feeds MXU).
    y = x_ref[...]
    if has_xj:
        y = y * xj_ref[...]
    y = y.astype(compute_dtype)

    for li in range(num_layers):
        w_ref = wb_refs[2 * li]
        b_ref = wb_refs[2 * li + 1]
        # MXU matmul in compute_dtype (f32 or bf16), f32 accumulation.
        y = jnp.dot(y, w_ref[...], preferred_element_type=jnp.float32)
        # Bias add (+ ReLU) epilogue kept in f32.
        y = y + b_ref[...].astype(jnp.float32)
        if li < num_layers - 1:
            y = jnp.maximum(y, 0.0)
            y = y.astype(compute_dtype)
        # F.dropout(training=False) -> identity at inference.

    o_ref[...] = y.astype(o_ref.dtype)


# ------------------------------ wrapper --------------------------------------

def _round_up(v, m):
    return (v + m - 1) // m * m


def mlp_forward(params, x, x_j=None, *, compute_dtype=jnp.float32, tm=4096):
    """Fused MLP forward. params = [(W_i, b_i)], W_i: (in_f, out_f), b_i: (out_f,)."""
    n, f_in = x.shape
    num_layers = len(params)
    has_xj = x_j is not None
    dims = [f_in] + [w.shape[1] for (w, _) in params]
    f_out = dims[-1]

    # ---- row tile: multiple of 8, no bigger than needed, fits default VMEM ----
    tm = int(max(8, min(tm, _round_up(n, 8))))
    tm = _round_up(tm, 8)

    x_bytes = jnp.dtype(x.dtype).itemsize
    w_bytes = jnp.dtype(compute_dtype).itemsize
    weights_bytes = sum(w.size * w_bytes + b.size * 4 for (w, b) in params)

    def _vmem_estimate(t):
        io = 2 * t * (f_in * x_bytes * (1 + int(has_xj)) + f_out * x_bytes)  # dbl-buffered I/O
        act = 2 * t * max(dims) * 4                                          # live f32 activations
        return io + act + 2 * weights_bytes

    budget = 12 << 20  # stay inside the default scoped-VMEM limit on all TPU gens
    while tm > 8 and _vmem_estimate(tm) > budget:
        tm = _round_up(max(8, tm // 2), 8)

    grid = (pl.cdiv(n, tm),)

    # ---- inputs & BlockSpecs: no HBM padding; feature axes use full-extent blocks,
    #      ragged edge rows are masked by Pallas (row-wise independent compute) ----
    inputs = [x]
    in_specs = [pl.BlockSpec((tm, f_in), lambda i: (i, 0))]
    if has_xj:
        inputs.append(x_j)
        in_specs.append(pl.BlockSpec((tm, f_in), lambda i: (i, 0)))
    for (w, b) in params:
        inputs.append(w.astype(compute_dtype))
        inputs.append(b.reshape(1, -1).astype(jnp.float32))
        # Weights/biases fully resident in VMEM (same block for every grid step).
        in_specs.append(pl.BlockSpec(w.shape, lambda i: (0, 0)))
        in_specs.append(pl.BlockSpec((1, b.shape[0]), lambda i: (0, 0)))

    out_specs = pl.BlockSpec((tm, f_out), lambda i: (i, 0))

    flops = 2 * n * sum(dims[i] * dims[i + 1] for i in range(num_layers))
    if has_xj:
        flops += n * f_in
    bytes_accessed = (n * f_in * x_bytes * (1 + int(has_xj))
                      + n * f_out * x_bytes + weights_bytes)

    kern = functools.partial(_mlp_fused_kernel, num_layers=num_layers,
                             has_xj=has_xj, compute_dtype=compute_dtype)

    return pl.pallas_call(
        kern,
        out_shape=jax.ShapeDtypeStruct((n, f_out), x.dtype),
        grid_spec=pltpu.PrefetchScalarGridSpec(
            num_scalar_prefetch=0,
            grid=grid,
            in_specs=in_specs,
            out_specs=out_specs,
        ),
        compiler_params=pltpu.CompilerParams(
            dimension_semantics=("parallel",)),
        cost_estimate=pl.CostEstimate(flops=int(flops), transcendentals=0,
                                      bytes_accessed=int(bytes_accessed)),
    )(*inputs)


# ------------------------------ MLP params -----------------------------------

def init_mlp_params(key, in_channels, hidden_channels, out_channels, num_layers):
    """Deterministic init mimicking torch.nn.Linear default (uniform +-1/sqrt(fan_in))."""
    dims = [in_channels] + [hidden_channels] * (num_layers - 1) + [out_channels]
    params = []
    for li in range(num_layers):
        fan_in, fan_out = dims[li], dims[li + 1]
        key, kw, kb = jax.random.split(key, 3)
        bound = 1.0 / jnp.sqrt(jnp.float32(fan_in))
        # stored pre-transposed: (in_features, out_features)
        w = jax.random.uniform(kw, (fan_in, fan_out), jnp.float32, -bound, bound)
        b = jax.random.uniform(kb, (fan_out,), jnp.float32, -bound, bound)
        params.append((w, b))
    return params


def mlp_forward_ref(params, x, x_j=None):
    if x_j is not None:
        x = x * x_j
    for (w, b) in params[:-1]:
        x = jnp.maximum(x @ w + b, 0.0)
    w, b = params[-1]
    return x @ w + b


# --------------------------------- main --------------------------------------

if __name__ == "__main__":
    key = jax.random.PRNGKey(0)

    in_channels, hidden_channels, out_channels = 32, 32, 16
    num_layers = 3
    dropout = 0.5  # unused at inference
    N = 203  # intentionally not a multiple of 8 -> exercises ragged-row edge handling

    kp, kx, kxj = jax.random.split(key, 3)
    params = init_mlp_params(kp, in_channels, hidden_channels, out_channels, num_layers)
    x = jax.random.normal(kx, (N, in_channels), jnp.float32)
    x_j = jax.random.normal(kxj, (N, in_channels), jnp.float32)

    ref = mlp_forward_ref(params, x, x_j)

    # f32 matmul path (exact vs reference).
    out = mlp_forward(params, x, x_j, compute_dtype=jnp.float32)
    out = jax.block_until_ready(out)
    assert out.shape == (N, out_channels)
    assert jnp.allclose(out, ref, atol=1e-5, rtol=1e-5), "f32 mismatch vs reference"

    # bf16 matmul path (f32 accumulation) — looser tolerance.
    out_bf16 = mlp_forward(params, x, x_j, compute_dtype=jnp.bfloat16)
    out_bf16 = jax.block_until_ready(out_bf16)
    assert out_bf16.shape == (N, out_channels)
    assert jnp.allclose(out_bf16, ref, atol=1e-1, rtol=1e-1), "bf16 mismatch vs reference"

    # x_j=None path (no elementwise multiply).
    out_noxj = jax.block_until_ready(mlp_forward(params, x, None))
    assert jnp.allclose(out_noxj, mlp_forward_ref(params, x, None),
                        atol=1e-5, rtol=1e-5), "x_j=None mismatch vs reference"

    print("KERNEL_OK")
</pallas_src>

<mosaic_0001>
module attributes {stable_mosaic.version = 11 : i64} {
  func.func @_mlp_fused_kernel(%arg0: i32, %arg1: memref<208x32xf32, #tpu.memory_space<vmem>>, %arg2: memref<208x32xf32, #tpu.memory_space<vmem>>, %arg3: memref<32x32xf32, #tpu.memory_space<vmem>>, %arg4: memref<1x32xf32, #tpu.memory_space<vmem>>, %arg5: memref<32x32xf32, #tpu.memory_space<vmem>>, %arg6: memref<1x32xf32, #tpu.memory_space<vmem>>, %arg7: memref<32x16xf32, #tpu.memory_space<vmem>>, %arg8: memref<1x16xf32, #tpu.memory_space<vmem>>, %arg9: memref<208x16xf32, #tpu.memory_space<vmem>>) attributes {dimension_semantics = [#tpu.dimension_semantics<parallel>], iteration_bounds = array<i64: 1>, scalar_prefetch = 0 : i64, scratch_operands = 0 : i64, tpu.core_type = #tpu.core_type<tc>, window_params = [{transform_indices = @transform_0, window_bounds = array<i64: 208, 32>}, {transform_indices = @transform_1, window_bounds = array<i64: 208, 32>}, {pipeline_mode = #tpu.pipeline_mode<synchronous>, transform_indices = @transform_2, window_bounds = array<i64: 32, 32>}, {pipeline_mode = #tpu.pipeline_mode<synchronous>, transform_indices = @transform_3, window_bounds = array<i64: 1, 32>}, {pipeline_mode = #tpu.pipeline_mode<synchronous>, transform_indices = @transform_4, window_bounds = array<i64: 32, 32>}, {pipeline_mode = #tpu.pipeline_mode<synchronous>, transform_indices = @transform_5, window_bounds = array<i64: 1, 32>}, {pipeline_mode = #tpu.pipeline_mode<synchronous>, transform_indices = @transform_6, window_bounds = array<i64: 32, 16>}, {pipeline_mode = #tpu.pipeline_mode<synchronous>, transform_indices = @transform_7, window_bounds = array<i64: 1, 16>}, {transform_indices = @transform_8, window_bounds = array<i64: 208, 16>}]} {
    %c0 = arith.constant 0 : index
    %c0_0 = arith.constant 0 : index
    %0 = vector.load %arg1[%c0, %c0_0] : memref<208x32xf32, #tpu.memory_space<vmem>>, vector<208x32xf32>
    %c0_1 = arith.constant 0 : index
    %c0_2 = arith.constant 0 : index
    %1 = vector.load %arg2[%c0_1, %c0_2] : memref<208x32xf32, #tpu.memory_space<vmem>>, vector<208x32xf32>
    %2 = arith.mulf %0, %1 : vector<208x32xf32>
    %c0_3 = arith.constant 0 : index
    %c0_4 = arith.constant 0 : index
    %3 = vector.load %arg3[%c0_3, %c0_4] : memref<32x32xf32, #tpu.memory_space<vmem>>, vector<32x32xf32>
    %cst = arith.constant dense<0.000000e+00> : vector<208x32xf32>
    %4 = tpu.matmul %2, %3, %cst {dimension_numbers = #tpu.dot_dimension_numbers<[1], [0], [0], [1], [0, 0, 1, 1], [], []>} : vector<208x32xf32>, vector<32x32xf32>, vector<208x32xf32> -> vector<208x32xf32>
    %c0_5 = arith.constant 0 : index
    %c0_6 = arith.constant 0 : index
    %5 = vector.load %arg4[%c0_5, %c0_6] : memref<1x32xf32, #tpu.memory_space<vmem>>, vector<1x32xf32>
    %6 = vector.broadcast %5 : vector<1x32xf32> to vector<208x32xf32>
    %7 = arith.addf %4, %6 : vector<208x32xf32>
    %cst_7 = arith.constant 0.000000e+00 : f32
    %8 = vector.broadcast %cst_7 : f32 to vector<208x32xf32>
    %9 = arith.maximumf %7, %8 : vector<208x32xf32>
    %c0_8 = arith.constant 0 : index
    %c0_9 = arith.constant 0 : index
    %10 = vector.load %arg5[%c0_8, %c0_9] : memref<32x32xf32, #tpu.memory_space<vmem>>, vector<32x32xf32>
    %cst_10 = arith.constant dense<0.000000e+00> : vector<208x32xf32>
    %11 = tpu.matmul %9, %10, %cst_10 {dimension_numbers = #tpu.dot_dimension_numbers<[1], [0], [0], [1], [0, 0, 1, 1], [], []>} : vector<208x32xf32>, vector<32x32xf32>, vector<208x32xf32> -> vector<208x32xf32>
    %c0_11 = arith.constant 0 : index
    %c0_12 = arith.constant 0 : index
    %12 = vector.load %arg6[%c0_11, %c0_12] : memref<1x32xf32, #tpu.memory_space<vmem>>, vector<1x32xf32>
    %13 = vector.broadcast %12 : vector<1x32xf32> to vector<208x32xf32>
    %14 = arith.addf %11, %13 : vector<208x32xf32>
    %cst_13 = arith.constant 0.000000e+00 : f32
    %15 = vector.broadcast %cst_13 : f32 to vector<208x32xf32>
    %16 = arith.maximumf %14, %15 : vector<208x32xf32>
    %c0_14 = arith.constant 0 : index
    %c0_15 = arith.constant 0 : index
    %17 = vector.load %arg7[%c0_14, %c0_15] : memref<32x16xf32, #tpu.memory_space<vmem>>, vector<32x16xf32>
    %cst_16 = arith.constant dense<0.000000e+00> : vector<208x16xf32>
    %18 = tpu.matmul %16, %17, %cst_16 {dimension_numbers = #tpu.dot_dimension_numbers<[1], [0], [0], [1], [0, 0, 1, 1], [], []>} : vector<208x32xf32>, vector<32x16xf32>, vector<208x16xf32> -> vector<208x16xf32>
    %c0_17 = arith.constant 0 : index
    %c0_18 = arith.constant 0 : index
    %19 = vector.load %arg8[%c0_17, %c0_18] : memref<1x16xf32, #tpu.memory_space<vmem>>, vector<1x16xf32>
    %20 = vector.broadcast %19 : vector<1x16xf32> to vector<208x16xf32>
    %21 = arith.addf %18, %20 : vector<208x16xf32>
    %c0_19 = arith.constant 0 : index
    %c0_20 = arith.constant 0 : index
    %22 = vector.load %arg9[%c0_19, %c0_20] : memref<208x16xf32, #tpu.memory_space<vmem>>, vector<208x16xf32>
    tpu.vector_store %arg9[%c0_19, %c0_20], %21 {strides = array<i32>} : memref<208x16xf32, #tpu.memory_space<vmem>>, vector<208x16xf32>,
    return
  }
  func.func @transform_0(%arg0: i32) -> (i32, i32) {
    %c0_i32 = arith.constant 0 : i32
    %c0_i32_0 = arith.constant 0 : i32
    return %arg0, %c0_i32 : i32, i32
  }
  func.func @transform_1(%arg0: i32) -> (i32, i32) {
    %c0_i32 = arith.constant 0 : i32
    %c0_i32_0 = arith.constant 0 : i32
    return %arg0, %c0_i32 : i32, i32
  }
  func.func @transform_2(%arg0: i32) -> (i32, i32) {
    %c0_i32 = arith.constant 0 : i32
    %c0_i32_0 = arith.constant 0 : i32
    %c0_i32_1 = arith.constant 0 : i32
    return %c0_i32, %c0_i32_0 : i32, i32
  }
  func.func @transform_3(%arg0: i32) -> (i32, i32) {
    %c0_i32 = arith.constant 0 : i32
    %c0_i32_0 = arith.constant 0 : i32
    %c0_i32_1 = arith.constant 0 : i32
    return %c0_i32, %c0_i32_0 : i32, i32
  }
  func.func @transform_4(%arg0: i32) -> (i32, i32) {
    %c0_i32 = arith.constant 0 : i32
    %c0_i32_0 = arith.constant 0 : i32
    %c0_i32_1 = arith.constant 0 : i32
    return %c0_i32, %c0_i32_0 : i32, i32
  }
  func.func @transform_5(%arg0: i32) -> (i32, i32) {
    %c0_i32 = arith.constant 0 : i32
    %c0_i32_0 = arith.constant 0 : i32
    %c0_i32_1 = arith.constant 0 : i32
    return %c0_i32, %c0_i32_0 : i32, i32
  }
  func.func @transform_6(%arg0: i32) -> (i32, i32) {
    %c0_i32 = arith.constant 0 : i32
    %c0_i32_0 = arith.constant 0 : i32
    %c0_i32_1 = arith.constant 0 : i32
    return %c0_i32, %c0_i32_0 : i32, i32
  }
  func.func @transform_7(%arg0: i32) -> (i32, i32) {
    %c0_i32 = arith.constant 0 : i32
    %c0_i32_0 = arith.constant 0 : i32
    %c0_i32_1 = arith.constant 0 : i32
    return %c0_i32, %c0_i32_0 : i32, i32
  }
  func.func @transform_8(%arg0: i32) -> (i32, i32) {
    %c0_i32 = arith.constant 0 : i32
    %c0_i32_0 = arith.constant 0 : i32
    return %arg0, %c0_i32 : i32, i32
  }
}

</mosaic_0001>

<bundles_post_ra>
// kernel: tpu_custom_call.1
= control target key start
LH: loop header
LB: loop body
LE: loop exit
PB: predicated region body
PF: predicated region fallthrough
CT: control target
= control target key end

     0   :  { %vm118_vm0 = vcmask 261120   ;;  %vm1012_vm1 = vcmask 130048   ;;  %s1875_s2 = inlined_call_operand.vmem [shape: f32[32,32], index: 2, kind: input, shape index: {}]   ;;  %s1876_s0 = inlined_call_operand.vmem [shape: f32[203,32], index: 0, kind: input, shape index: {}]   ;;  %s1877_s1 = inlined_call_operand.vmem [shape: f32[203,32], index: 1, kind: input, shape index: {}]   ;;  %s1878_s4 = inlined_call_operand.vmem [shape: f32[32,32], index: 4, kind: input, shape index: {}]   ;;  %s1879_s6 = inlined_call_operand.vmem [shape: f32[32,16], index: 6, kind: input, shape index: {}]   ;;  %s1880_s3 = inlined_call_operand.vmem [shape: f32[1,32], index: 3, kind: input, shape index: {}]   ;;  %s1881_s5 = inlined_call_operand.vmem [shape: f32[1,32], index: 5, kind: input, shape index: {}]   ;;  %s1882_s7 = inlined_call_operand.vmem [shape: f32[1,16], index: 7, kind: input, shape index: {}]   ;;  %s1883_s8 = inlined_call_operand.vmem [shape: f32[203,16], index: 8, kind: output, shape index: {}]  }
   0x1   :  { %v110_v0 = vld [vmem:[%s1875_s2 + $0x18] sm:$0xff]  ;;  %v109_v1 = vld [vmem:[%s1875_s2 + $0x10] sm:$0xff]  ;;  %v29_v2 = vld [vmem:[%s1876_s0] sm:$0xff] }
   0x2   :  { %1214 = vmatprep.subr.mxu0 %v110_v0  ;;  %v55_v3 = vld [vmem:[%s1877_s1] sm:$0xff]  ;;  %1355 = vmatprep.subr.mxu1 %v110_v0  ;;  %v108_v4 = vld [vmem:[%s1875_s2 + $0x8] sm:$0xff]  ;;  %v31_v8 = vld [vmem:[%s1876_s0 + $0x10] sm:$0xff] }
   0x3   :  { %1215 = vmatpush3.msra.mxu0 %v110_v0  ;;  %v81_v5 = vmul.f32 %v55_v3, %v29_v2  ;;  %v30_v6 = vld [vmem:[%s1876_s0 + $0x8] sm:$0xff]  ;;  %1359 = vmatpush3.msra.mxu1 %v110_v0  ;;  %v57_v9 = vld [vmem:[%s1877_s1 + $0x10] sm:$0xff]  ;;  %v107_v10 = vld [vmem:[%s1875_s2] sm:$0xff] }
   0x4   :  { %v56_v7 = vld [vmem:[%s1877_s1 + $0x8] sm:$0xff]  ;;  %1216 = vmatprep.subr.mxu0 %v109_v1  ;;  %1356 = vmatprep.subr.mxu1 %v109_v1  ;;  %v83_v12 = vmul.f32 %v57_v9, %v31_v8  ;;  %v32_v13 = vld [vmem:[%s1876_s0 + $0x18] sm:$0xff]  ;;  %v33_v15 = vld [vmem:[%s1876_s0 + $0x20] sm:$0xff] }
   0x5   :  { %1217 = vmatpush3.msra.mxu0 %v109_v1  ;;  %1222 = vmatprep.mubr.msk.f32.mxu0 %vm118_vm0, %v81_v5  ;;  %v82_v11 = vmul.f32 %v56_v7, %v30_v6  ;;  %v58_v14 = vld [vmem:[%s1877_s1 + $0x18] sm:$0xff]  ;;  %v59_v16 = vld [vmem:[%s1877_s1 + $0x20] sm:$0xff]  ;;  %v34_v18 = vld [vmem:[%s1876_s0 + $0x28] sm:$0xff] }
   0x6   :  { %1218 = vmatprep.subr.mxu0 %v108_v4  ;;  %1360 = vmatpush3.msra.mxu1 %v109_v1  ;;  %v84_v17 = vmul.f32 %v58_v14, %v32_v13  ;;  %v60_v19 = vld [vmem:[%s1877_s1 + $0x28] sm:$0xff]  ;;  %v85_v20 = vmul.f32 %v59_v16, %v33_v15  ;;  %v35_v21 = vld [vmem:[%s1876_s0 + $0x30] sm:$0xff]  ;;  %v44_v25 = vld [vmem:[%s1876_s0 + $0x78] sm:$0xff] }
   0x7   :  { %1219 = vmatpush3.msra.mxu0 %v108_v4  ;;  %1357 = vmatprep.subr.mxu1 %v108_v4  ;;  %v61_v22 = vld [vmem:[%s1877_s1 + $0x30] sm:$0xff]  ;;  %v70_v26 = vld [vmem:[%s1877_s1 + $0x78] sm:$0xff]  ;;  %v45_v29 = vld [vmem:[%s1876_s0 + $0x80] sm:$0xff]  ;;  %v86_v32 = vmul.f32 %v60_v19, %v34_v18 }
   0x8   :  { %1220 = vmatprep.subr.mxu0 %v107_v10  ;;  %1361 = vmatpush3.msra.mxu1 %v108_v4  ;;  %v43_v23 = vld [vmem:[%s1876_s0 + $0x70] sm:$0xff]  ;;  %v96_v28 = vmul.f32 %v70_v26, %v44_v25  ;;  %v71_v30 = vld [vmem:[%s1877_s1 + $0x80] sm:$0xff]  ;;  %v46_v31 = vld [vmem:[%s1876_s0 + $0x88] sm:$0xff]  ;;  %v87_v37 = vmul.f32 %v61_v22, %v35_v21 }
   0x9   :  { %1221 = vmatpush3.msra.mxu0 %v107_v10  ;;  %1358 = vmatprep.subr.mxu1 %v107_v10  ;;  %v69_v24 = vld [vmem:[%s1877_s1 + $0x70] sm:$0xff]  ;;  %v97_v33 = vmul.f32 %v71_v30, %v45_v29  ;;  %v72_v34 = vld [vmem:[%s1877_s1 + $0x88] sm:$0xff]  ;;  %v36_v38 = vld [vmem:[%s1876_s0 + $0x38] sm:$0xff] }
   0xa   :  { %1223 = vmatmul.mubr.msk.f32.vlgmr.msra.gmra.mxu0 %vm118_vm0, %v82_v11  ;;  %1362 = vmatpush3.msra.mxu1 %v107_v10  ;;  %v95_v27 = vmul.f32 %v69_v24, %v43_v23  ;;  %v47_v35 = vld [vmem:[%s1876_s0 + $0x90] sm:$0xff]  ;;  %v62_v39 = vld [vmem:[%s1877_s1 + $0x38] sm:$0xff]  ;;  %v37_v40 = vld [vmem:[%s1876_s0 + $0x40] sm:$0xff]  ;;  %v98_v42 = vmul.f32 %v72_v34, %v46_v31 }
   0xb   :  { %1225 = vmatprep.mubr.msk.f32.mxu0 %vm118_vm0, %v83_v12  ;;  %v73_v36 = vld [vmem:[%s1877_s1 + $0x90] sm:$0xff]  ;;  %v63_v41 = vld [vmem:[%s1877_s1 + $0x40] sm:$0xff]  ;;  %v48_v44 = vld [vmem:[%s1876_s0 + $0x98] sm:$0xff]  ;;  %v88_v46 = vmul.f32 %v62_v39, %v36_v38 }
   0xc   :  { %1243 = vmatprep.mubr.msk.f32.mxu1 %vm118_vm0, %v95_v27  ;;  %v99_v43 = vmul.f32 %v73_v36, %v47_v35  ;;  %v74_v45 = vld [vmem:[%s1877_s1 + $0x98] sm:$0xff]  ;;  %v49_v47 = vld [vmem:[%s1876_s0 + $0xa0] sm:$0xff]  ;;  %v89_v49 = vmul.f32 %v63_v41, %v37_v40  ;;  %v38_v50 = vld [vmem:[%s1876_s0 + $0x48] sm:$0xff] }
   0xd   :  { %1244 = vmatmul.mubr.msk.f32.vlgmr.msra.gmra.mxu1 %vm118_vm0, %v96_v28  ;;  %v75_v48 = vld [vmem:[%s1877_s1 + $0xa0] sm:$0xff]  ;;  %v64_v51 = vld [vmem:[%s1877_s1 + $0x48] sm:$0xff]  ;;  %v421_v52 = vld [vmem:[%s1878_s4 + $0x18] sm:$0xff]  ;;  %v100_v55 = vmul.f32 %v74_v45, %v48_v44 }
   0xe   :  { %1226 = vmatmul.mubr.msk.f32.gmra.mxu0 %vm118_vm0, %v84_v17  ;;  %1246 = vmatprep.mubr.msk.f32.mxu1 %vm118_vm0, %v97_v33  ;;  %v39_v53 = vld [vmem:[%s1876_s0 + $0x50] sm:$0xff]  ;;  %v101_v57 = vmul.f32 %v75_v48, %v49_v47  ;;  %v50_v58 = vld [vmem:[%s1876_s0 + $0xa8] sm:$0xff]  ;;  %v90_v61 = vmul.f32 %v64_v51, %v38_v50  ;;  %v40_v1 = vld [vmem:[%s1876_s0 + $0x58] sm:$0xff] }
   0xf   :  { %1228 = vmatprep.mubr.msk.f32.mxu0 %vm118_vm0, %v85_v20  ;;  %v65_v54 = vld [vmem:[%s1877_s1 + $0x50] sm:$0xff]  ;;  %1261 = vmatprep.subr.mxu1 %v421_v52  ;;  %v76_v59 = vld [vmem:[%s1877_s1 + $0xa8] sm:$0xff]  ;;  %v66_v2 = vld [vmem:[%s1877_s1 + $0x58] sm:$0xff] }
  0x10   :  { %v420_v56 = vld [vmem:[%s1878_s4 + $0x10] sm:$0xff]  ;;  %1262 = vmatpush3.msra.mxu1 %v421_v52  ;;  %v419_v60 = vld [vmem:[%s1878_s4 + $0x8] sm:$0xff]  ;;  %v91_v0 = vmul.f32 %v65_v54, %v39_v53  ;;  %v41_v3 = vld [vmem:[%s1876_s0 + $0x60] sm:$0xff]  ;;  %v102_v5 = vmul.f32 %v76_v59, %v50_v58  ;;  %v92_v9 = vmul.f32 %v66_v2, %v40_v1 }
  0x11   :  { %1247 = vmatmul.mubr.msk.f32.gmra.mxu1 %vm118_vm0, %v98_v42  ;;  %v51_v62 = vld [vmem:[%s1876_s0 + $0xb0] sm:$0xff]  ;;  %1263 = vmatprep.subr.mxu1 %v420_v56  ;;  %v67_v4 = vld [vmem:[%s1877_s1 + $0x60] sm:$0xff]  ;;  %v52_v7 = vld [vmem:[%s1876_s0 + $0xb8] sm:$0xff] }
  0x12   :  { %1229 = vmatmul.mubr.msk.f32.gmra.mxu0 %vm118_vm0, %v86_v32  ;;  %1249 = vmatprep.mubr.msk.f32.mxu1 %vm118_vm0, %v99_v43  ;;  %v77_v63 = vld [vmem:[%s1877_s1 + $0xb0] sm:$0xff]  ;;  %v78_v8 = vld [vmem:[%s1877_s1 + $0xb8] sm:$0xff]  ;;  %v53_v10 = vld [vmem:[%s1876_s0 + $0xc0] sm:$0xff]  ;;  %v93_v12 = vmul.f32 %v67_v4, %v41_v3 }
  0x13   :  { %1231 = vmatprep.mubr.msk.f32.mxu0 %vm118_vm0, %v87_v37  ;;  %1264 = vmatpush3.msra.mxu1 %v420_v56  ;;  %v103_v6 = vmul.f32 %v77_v63, %v51_v62  ;;  %v79_v11 = vld [vmem:[%s1877_s1 + $0xc0] sm:$0xff]  ;;  %v42_v13 = vld [vmem:[%s1876_s0 + $0x68] sm:$0xff]  ;;  %v104_v15 = vmul.f32 %v78_v8, %v52_v7  ;;  %v731_v22 = vld [vmem:[%s1879_s6 + $0x18] sm:$0xff] }
  0x14   :  { %1265 = vmatprep.subr.mxu1 %v419_v60  ;;  %v68_v14 = vld [vmem:[%s1877_s1 + $0x68] sm:$0xff]  ;;  %v105_v16 = vmul.f32 %v79_v11, %v53_v10  ;;  %v418_v21 = vld [vmem:[%s1878_s4] sm:$0xff]  ;;  %v730_v23 = vld [vmem:[%s1879_s6 + $0x10] sm:$0xff]  ;;  %1308 = vmatprep.subr.mxu0 %v731_v22 }
  0x15   :  { %1250 = vmatmul.mubr.msk.f32.gmra.mxu1 %vm118_vm0, %v100_v55  ;;  %v54_v17 = vld [vmem:[%s1876_s0 + $0xc8] sm:$0xff]  ;;  %v94_v19 = vmul.f32 %v68_v14, %v42_v13  ;;  %1309 = vmatpush3.msra.mxu0 %v731_v22  ;;  %v1626_v25 = vld [vmem:[%s1880_s3] ss:$0 sm:$0xff] }
  0x16   :  { %1232 = vmatmul.mubr.msk.f32.gmra.mxu0 %vm118_vm0, %v88_v46  ;;  %1252 = vmatprep.mubr.msk.f32.mxu1 %vm118_vm0, %v101_v57  ;;  %v80_v18 = vld [vmem:[%s1877_s1 + $0xc8] sm:$0xff] }
  0x17   :  { %1234 = vmatprep.mubr.msk.f32.mxu0 %vm118_vm0, %v89_v49  ;;  %1266 = vmatpush3.msra.mxu1 %v419_v60  ;;  %v106_v20 = vmul.f32 %v80_v18, %v54_v17  ;;  %v729_v24 = vld [vmem:[%s1879_s6 + $0x8] sm:$0xff] }
  0x18   :  { %1267 = vmatprep.subr.mxu1 %v418_v21  ;;  %1310 = vmatprep.subr.mxu0 %v730_v23 }
  0x19   :  { %1253 = vmatmul.mubr.msk.f32.gmra.mxu1 %vm118_vm0, %v102_v5  ;;  %1311 = vmatpush3.msra.mxu0 %v730_v23 }
  0x1a   :  { %1235 = vmatmul.mubr.msk.f32.gmra.mxu0 %vm118_vm0, %v90_v61  ;;  %1255 = vmatprep.mubr.msk.f32.mxu1 %vm118_vm0, %v103_v6 }
  0x1b   :  { %1237 = vmatprep.mubr.msk.f32.mxu0 %vm118_vm0, %v91_v0  ;;  %1268 = vmatpush3.msra.mxu1 %v418_v21 }
  0x1c   :  { %1312 = vmatprep.subr.mxu0 %v729_v24 }
  0x1d   :  { %1256 = vmatmul.mubr.msk.f32.gmra.mxu1 %vm118_vm0, %v104_v15  ;;  %1313 = vmatpush3.msra.mxu0 %v729_v24 }
  0x1e   :  { %1238 = vmatmul.mubr.msk.f32.gmra.mxu0 %vm118_vm0, %v92_v9  ;;  %1258 = vmatprep.mubr.msk.f32.mxu1 %vm118_vm0, %v105_v16 }
  0x1f   :  { %1240 = vmatprep.mubr.msk.f32.mxu0 %vm118_vm0, %v93_v12 }
  0x21   :  { %1259 = vmatmul.mubr.msk.f32.gmra.mxu1 %vm118_vm0, %v106_v20 }
  0x22   :  { %1241 = vmatmul.mubr.msk.f32.gmra.mxu0 %vm118_vm0, %v94_v19 }
  0xca   :  { %v1224_v26 = vpop.f32.mrf.mxu0 }
  0xcb   :  { %v269_v27 = vadd.f32 %v1224_v26, %v1626_v25 }
  0xcc   :  { %v263_v28 = vpop.f32.mrf.mxu0 }
  0xcd   :  { %v264_v29 = vadd.f32 %v1626_v25, %v263_v28  ;;  %v393_v32 = vmax.f32 %v269_v27, 0.0  ;;  %v1245_v35 = vpop.f32.mrf.mxu1 }
  0xce   :  { %v1227_v30 = vpop.f32.mrf.mxu0  ;;  %v339_v15 = vadd.f32 %v1245_v35, %v1626_v25 }
  0xcf   :  { %v392_v31 = vmax.f32 %v264_v29, 0.0  ;;  %v279_v33 = vadd.f32 %v1227_v30, %v1626_v25  ;;  %v333_v38 = vpop.f32.mrf.mxu1 }
  0xd0   :  { %v273_v34 = vpop.f32.mrf.mxu0  ;;  %v334_v5 = vadd.f32 %v1626_v25, %v333_v38  ;;  %v407_v19 = vmax.f32 %v339_v15, 0.0 }
  0xd1   :  { %v274_v36 = vadd.f32 %v1626_v25, %v273_v34  ;;  %1269 = vmatprep.mubr.msk.f32.mxu1 %vm118_vm0, %v392_v31  ;;  %v395_v40 = vmax.f32 %v279_v33, 0.0  ;;  %v1248_v43 = vpop.f32.mrf.mxu1 }
  0xd2   :  { %v1230_v37 = vpop.f32.mrf.mxu0  ;;  %1270 = vmatmul.mubr.msk.f32.vlgmr.msra.gmra.mxu1 %vm118_vm0, %v393_v32  ;;  %v406_v12 = vmax.f32 %v334_v5, 0.0  ;;  %v349_v20 = vadd.f32 %v1248_v43, %v1626_v25 }
  0xd3   :  { %v394_v39 = vmax.f32 %v274_v36, 0.0  ;;  %v289_v41 = vadd.f32 %v1230_v37, %v1626_v25  ;;  %v343_v46 = vpop.f32.mrf.mxu1 }
  0xd4   :  { %v283_v42 = vpop.f32.mrf.mxu0  ;;  %v344_v13 = vadd.f32 %v1626_v25, %v343_v46  ;;  %v409_v24 = vmax.f32 %v349_v20, 0.0 }
  0xd5   :  { %v284_v44 = vadd.f32 %v1626_v25, %v283_v42  ;;  %1272 = vmatprep.mubr.msk.f32.mxu1 %vm118_vm0, %v394_v39  ;;  %v397_v48 = vmax.f32 %v289_v41, 0.0  ;;  %v1251_v51 = vpop.f32.mrf.mxu1  ;;  %v728_v41 = vld [vmem:[%s1879_s6] sm:$0xff] }
  0xd6   :  { %v1233_v45 = vpop.f32.mrf.mxu0  ;;  %1273 = vmatmul.mubr.msk.f32.gmra.mxu1 %vm118_vm0, %v395_v40  ;;  %v408_v17 = vmax.f32 %v344_v13, 0.0  ;;  %v359_v26 = vadd.f32 %v1251_v51, %v1626_v25  ;;  %1314 = vmatprep.subr.mxu0 %v728_v41  ;;  %v1686_v42 = vld [vmem:[%s1881_s5] ss:$0 sm:$0xff] }
  0xd7   :  { %v396_v47 = vmax.f32 %v284_v44, 0.0  ;;  %v299_v49 = vadd.f32 %v1233_v45, %v1626_v25  ;;  %v353_v58 = vpop.f32.mrf.mxu1  ;;  %1315 = vmatpush3.msra.mxu0 %v728_v41 }
  0xd8   :  { %v293_v50 = vpop.f32.mrf.mxu0  ;;  %v354_v18 = vadd.f32 %v1626_v25, %v353_v58  ;;  %v411_v30 = vmax.f32 %v359_v26, 0.0 }
  0xd9   :  { %v294_v52 = vadd.f32 %v1626_v25, %v293_v50  ;;  %1275 = vmatprep.mubr.msk.f32.mxu1 %vm118_vm0, %v396_v47  ;;  %v399_v55 = vmax.f32 %v299_v49, 0.0  ;;  %v1254_v1 = vpop.f32.mrf.mxu1 }
  0xda   :  { %v1236_v53 = vpop.f32.mrf.mxu0  ;;  %1276 = vmatmul.mubr.msk.f32.gmra.mxu1 %vm118_vm0, %v397_v48  ;;  %v410_v22 = vmax.f32 %v354_v18, 0.0  ;;  %v369_v31 = vadd.f32 %v1254_v1, %v1626_v25 }
  0xdb   :  { %v398_v54 = vmax.f32 %v294_v52, 0.0  ;;  %v309_v56 = vadd.f32 %v1236_v53, %v1626_v25  ;;  %v363_v9 = vpop.f32.mrf.mxu1 }
  0xdc   :  { %v303_v57 = vpop.f32.mrf.mxu0  ;;  %v364_v23 = vadd.f32 %v1626_v25, %v363_v9  ;;  %v413_v35 = vmax.f32 %v369_v31, 0.0 }
  0xdd   :  { %v304_v59 = vadd.f32 %v1626_v25, %v303_v57  ;;  %1278 = vmatprep.mubr.msk.f32.mxu1 %vm118_vm0, %v398_v54  ;;  %v401_v62 = vmax.f32 %v309_v56, 0.0  ;;  %v1257_v16 = vpop.f32.mrf.mxu1 }
  0xde   :  { %v1239_v60 = vpop.f32.mrf.mxu0  ;;  %1279 = vmatmul.mubr.msk.f32.gmra.mxu1 %vm118_vm0, %v399_v55  ;;  %v412_v28 = vmax.f32 %v364_v23, 0.0  ;;  %v379_v36 = vadd.f32 %v1257_v16, %v1626_v25 }
  0xdf   :  { %v400_v61 = vmax.f32 %v304_v59, 0.0  ;;  %v319_v63 = vadd.f32 %v1239_v60, %v1626_v25  ;;  %v373_v21 = vpop.f32.mrf.mxu1 }
  0xe0   :  { %v313_v0 = vpop.f32.mrf.mxu0  ;;  %v374_v29 = vadd.f32 %v1626_v25, %v373_v21  ;;  %v415_v38 = vmax.f32 %v379_v36, 0.0 }
  0xe1   :  { %v314_v2 = vadd.f32 %v1626_v25, %v313_v0  ;;  %1281 = vmatprep.mubr.msk.f32.mxu1 %vm118_vm0, %v400_v61  ;;  %v403_v6 = vmax.f32 %v319_v63, 0.0  ;;  %v1260_v27 = vpop.f32.mrf.mxu1 }
  0xe2   :  { %v1242_v3 = vpop.f32.mrf.mxu0  ;;  %1282 = vmatmul.mubr.msk.f32.gmra.mxu1 %vm118_vm0, %v401_v62  ;;  %v414_v33 = vmax.f32 %v374_v29, 0.0  ;;  %v389_v39 = vadd.f32 %v1260_v27, %v1626_v25 }
  0xe3   :  { %v402_v4 = vmax.f32 %v314_v2, 0.0  ;;  %v329_v7 = vadd.f32 %v1242_v3, %v1626_v25  ;;  %v383_v32 = vpop.f32.mrf.mxu1 }
  0xe4   :  { %v323_v8 = vpop.f32.mrf.mxu0  ;;  %v384_v34 = vadd.f32 %v1626_v25, %v383_v32  ;;  %v417_v40 = vmax.f32 %v389_v39, 0.0 }
  0xe5   :  { %v324_v10 = vadd.f32 %v1626_v25, %v323_v8  ;;  %1284 = vmatprep.mubr.msk.f32.mxu1 %vm118_vm0, %v402_v4  ;;  %v405_v14 = vmax.f32 %v329_v7, 0.0 }
  0xe6   :  { %1285 = vmatmul.mubr.msk.f32.gmra.mxu1 %vm118_vm0, %v403_v6  ;;  %v416_v37 = vmax.f32 %v384_v34, 0.0 }
  0xe7   :  { %v404_v11 = vmax.f32 %v324_v10, 0.0 }
  0xe9   :  { %1287 = vmatprep.mubr.msk.f32.mxu1 %vm118_vm0, %v404_v11 }
  0xea   :  { %1288 = vmatmul.mubr.msk.f32.gmra.mxu1 %vm118_vm0, %v405_v14 }
  0xeb   :  { %1290 = vmatprep.mubr.msk.f32.mxu1 %vm118_vm0, %v406_v12 }
  0xee   :  { %1291 = vmatmul.mubr.msk.f32.gmra.mxu1 %vm118_vm0, %v407_v19 }
  0xef   :  { %1293 = vmatprep.mubr.msk.f32.mxu1 %vm118_vm0, %v408_v17 }
  0xf2   :  { %1294 = vmatmul.mubr.msk.f32.gmra.mxu1 %vm118_vm0, %v409_v24 }
  0xf3   :  { %1296 = vmatprep.mubr.msk.f32.mxu1 %vm118_vm0, %v410_v22 }
  0xf6   :  { %1297 = vmatmul.mubr.msk.f32.gmra.mxu1 %vm118_vm0, %v411_v30 }
  0xf7   :  { %1299 = vmatprep.mubr.msk.f32.mxu1 %vm118_vm0, %v412_v28 }
  0xfa   :  { %1300 = vmatmul.mubr.msk.f32.gmra.mxu1 %vm118_vm0, %v413_v35 }
  0xfb   :  { %1302 = vmatprep.mubr.msk.f32.mxu1 %vm118_vm0, %v414_v33 }
  0xfe   :  { %1303 = vmatmul.mubr.msk.f32.gmra.mxu1 %vm118_vm0, %v415_v38 }
  0xff   :  { %1305 = vmatprep.mubr.msk.f32.mxu1 %vm118_vm0, %v416_v37 }
 0x102   :  { %1306 = vmatmul.mubr.msk.f32.gmra.mxu1 %vm118_vm0, %v417_v40 }
 0x192   :  { %v1271_v43 = vpop.f32.mrf.mxu1 }
 0x193   :  { %v579_v25 = vadd.f32 %v1271_v43, %v1686_v42 }
 0x194   :  { %v573_v44 = vpop.f32.mrf.mxu1 }
 0x195   :  { %v574_v45 = vadd.f32 %v1686_v42, %v573_v44  ;;  %v703_v48 = vmax.f32 %v579_v25, 0.0 }
 0x196   :  { %v1274_v46 = vpop.f32.mrf.mxu1 }
 0x197   :  { %v702_v47 = vmax.f32 %v574_v45, 0.0  ;;  %v589_v49 = vadd.f32 %v1274_v46, %v1686_v42 }
 0x198   :  { %v583_v50 = vpop.f32.mrf.mxu1 }
 0x199   :  { %v584_v51 = vadd.f32 %v1686_v42, %v583_v50  ;;  %1316 = vmatprep.mubr.msk.f32.mxu0 %vm118_vm0, %v702_v47  ;;  %v705_v54 = vmax.f32 %v589_v49, 0.0 }
 0x19a   :  { %v1277_v52 = vpop.f32.mrf.mxu1  ;;  %1317 = vmatmul.mubr.msk.f32.vlgmr.msra.gmra.mxu0 %vm118_vm0, %v703_v48 }
 0x19b   :  { %v704_v53 = vmax.f32 %v584_v51, 0.0  ;;  %v599_v55 = vadd.f32 %v1277_v52, %v1686_v42 }
 0x19c   :  { %v593_v56 = vpop.f32.mrf.mxu1 }
 0x19d   :  { %v594_v57 = vadd.f32 %v1686_v42, %v593_v56  ;;  %1319 = vmatprep.mubr.msk.f32.mxu0 %vm118_vm0, %v704_v53  ;;  %v707_v60 = vmax.f32 %v599_v55, 0.0 }
 0x19e   :  { %v1280_v58 = vpop.f32.mrf.mxu1  ;;  %1320 = vmatmul.mubr.msk.f32.gmra.mxu0 %vm118_vm0, %v705_v54 }
 0x19f   :  { %v706_v59 = vmax.f32 %v594_v57, 0.0  ;;  %v609_v61 = vadd.f32 %v1280_v58, %v1686_v42  ;;  %v1743_v57 = vld [vmem:[%s1882_s7] ss:$0 sm:$0xff] }
 0x1a0   :  { %v603_v62 = vpop.f32.mrf.mxu1 }
 0x1a1   :  { %v604_v63 = vadd.f32 %v1686_v42, %v603_v62  ;;  %1322 = vmatprep.mubr.msk.f32.mxu0 %vm118_vm0, %v706_v59  ;;  %v709_v2 = vmax.f32 %v609_v61, 0.0 }
 0x1a2   :  { %v1283_v0 = vpop.f32.mrf.mxu1  ;;  %1323 = vmatmul.mubr.msk.f32.gmra.mxu0 %vm118_vm0, %v707_v60 }
 0x1a3   :  { %v708_v1 = vmax.f32 %v604_v63, 0.0  ;;  %v619_v3 = vadd.f32 %v1283_v0, %v1686_v42 }
 0x1a4   :  { %v613_v4 = vpop.f32.mrf.mxu1 }
 0x1a5   :  { %v614_v5 = vadd.f32 %v1686_v42, %v613_v4  ;;  %1325 = vmatprep.mubr.msk.f32.mxu0 %vm118_vm0, %v708_v1  ;;  %v711_v8 = vmax.f32 %v619_v3, 0.0 }
 0x1a6   :  { %v1286_v6 = vpop.f32.mrf.mxu1  ;;  %1326 = vmatmul.mubr.msk.f32.gmra.mxu0 %vm118_vm0, %v709_v2 }
 0x1a7   :  { %v710_v7 = vmax.f32 %v614_v5, 0.0  ;;  %v629_v9 = vadd.f32 %v1286_v6, %v1686_v42 }
 0x1a8   :  { %v623_v10 = vpop.f32.mrf.mxu1 }
 0x1a9   :  { %v624_v11 = vadd.f32 %v1686_v42, %v623_v10  ;;  %1328 = vmatprep.mubr.msk.f32.mxu0 %vm118_vm0, %v710_v7  ;;  %v713_v14 = vmax.f32 %v629_v9, 0.0 }
 0x1aa   :  { %v1289_v12 = vpop.f32.mrf.mxu1  ;;  %1329 = vmatmul.mubr.msk.f32.gmra.mxu0 %vm118_vm0, %v711_v8 }
 0x1ab   :  { %v712_v13 = vmax.f32 %v624_v11, 0.0  ;;  %v639_v15 = vadd.f32 %v1289_v12, %v1686_v42 }
 0x1ac   :  { %v633_v16 = vpop.f32.mrf.mxu1 }
 0x1ad   :  { %v634_v17 = vadd.f32 %v1686_v42, %v633_v16  ;;  %1331 = vmatprep.mubr.msk.f32.mxu0 %vm118_vm0, %v712_v13  ;;  %v715_v20 = vmax.f32 %v639_v15, 0.0 }
 0x1ae   :  { %v1292_v18 = vpop.f32.mrf.mxu1  ;;  %1332 = vmatmul.mubr.msk.f32.gmra.mxu0 %vm118_vm0, %v713_v14 }
 0x1af   :  { %v714_v19 = vmax.f32 %v634_v17, 0.0  ;;  %v649_v21 = vadd.f32 %v1292_v18, %v1686_v42 }
 0x1b0   :  { %v643_v22 = vpop.f32.mrf.mxu1 }
 0x1b1   :  { %v644_v23 = vadd.f32 %v1686_v42, %v643_v22  ;;  %1334 = vmatprep.mubr.msk.f32.mxu0 %vm118_vm0, %v714_v19  ;;  %v717_v27 = vmax.f32 %v649_v21, 0.0 }
 0x1b2   :  { %v1295_v24 = vpop.f32.mrf.mxu1  ;;  %1335 = vmatmul.mubr.msk.f32.gmra.mxu0 %vm118_vm0, %v715_v20 }
 0x1b3   :  { %v716_v26 = vmax.f32 %v644_v23, 0.0  ;;  %v659_v28 = vadd.f32 %v1295_v24, %v1686_v42 }
 0x1b4   :  { %v653_v29 = vpop.f32.mrf.mxu1 }
 0x1b5   :  { %v654_v30 = vadd.f32 %v1686_v42, %v653_v29  ;;  %1337 = vmatprep.mubr.msk.f32.mxu0 %vm118_vm0, %v716_v26  ;;  %v719_v33 = vmax.f32 %v659_v28, 0.0 }
 0x1b6   :  { %v1298_v31 = vpop.f32.mrf.mxu1  ;;  %1338 = vmatmul.mubr.msk.f32.gmra.mxu0 %vm118_vm0, %v717_v27 }
 0x1b7   :  { %v718_v32 = vmax.f32 %v654_v30, 0.0  ;;  %v669_v34 = vadd.f32 %v1298_v31, %v1686_v42 }
 0x1b8   :  { %v663_v35 = vpop.f32.mrf.mxu1 }
 0x1b9   :  { %v664_v36 = vadd.f32 %v1686_v42, %v663_v35  ;;  %1340 = vmatprep.mubr.msk.f32.mxu0 %vm118_vm0, %v718_v32  ;;  %v721_v39 = vmax.f32 %v669_v34, 0.0 }
 0x1ba   :  { %v1301_v37 = vpop.f32.mrf.mxu1  ;;  %1341 = vmatmul.mubr.msk.f32.gmra.mxu0 %vm118_vm0, %v719_v33 }
 0x1bb   :  { %v720_v38 = vmax.f32 %v664_v36, 0.0  ;;  %v679_v40 = vadd.f32 %v1301_v37, %v1686_v42 }
 0x1bc   :  { %v673_v41 = vpop.f32.mrf.mxu1 }
 0x1bd   :  { %v674_v43 = vadd.f32 %v1686_v42, %v673_v41  ;;  %1343 = vmatprep.mubr.msk.f32.mxu0 %vm118_vm0, %v720_v38  ;;  %v723_v45 = vmax.f32 %v679_v40, 0.0 }
 0x1be   :  { %v1304_v25 = vpop.f32.mrf.mxu1  ;;  %1344 = vmatmul.mubr.msk.f32.gmra.mxu0 %vm118_vm0, %v721_v39 }
 0x1bf   :  { %v722_v44 = vmax.f32 %v674_v43, 0.0  ;;  %v689_v46 = vadd.f32 %v1304_v25, %v1686_v42 }
 0x1c0   :  { %v683_v47 = vpop.f32.mrf.mxu1 }
 0x1c1   :  { %v684_v48 = vadd.f32 %v1686_v42, %v683_v47  ;;  %1346 = vmatprep.mubr.msk.f32.mxu0 %vm118_vm0, %v722_v44  ;;  %v725_v51 = vmax.f32 %v689_v46, 0.0 }
 0x1c2   :  { %v1307_v49 = vpop.f32.mrf.mxu1  ;;  %1347 = vmatmul.mubr.msk.f32.gmra.mxu0 %vm118_vm0, %v723_v45 }
 0x1c3   :  { %v724_v50 = vmax.f32 %v684_v48, 0.0  ;;  %v699_v52 = vadd.f32 %v1307_v49, %v1686_v42 }
 0x1c4   :  { %v693_v53 = vpop.f32.mrf.mxu1 }
 0x1c5   :  { %v694_v54 = vadd.f32 %v1686_v42, %v693_v53  ;;  %1349 = vmatprep.mubr.msk.f32.mxu0 %vm118_vm0, %v724_v50  ;;  %v727_v56 = vmax.f32 %v699_v52, 0.0 }
 0x1c6   :  { %1350 = vmatmul.mubr.msk.f32.gmra.mxu0 %vm118_vm0, %v725_v51 }
 0x1c7   :  { %v726_v55 = vmax.f32 %v694_v54, 0.0 }
 0x1c9   :  { %1352 = vmatprep.mubr.msk.f32.mxu0 %vm118_vm0, %v726_v55 }
 0x1ca   :  { %1353 = vmatmul.mubr.msk.f32.gmra.mxu0 %vm118_vm0, %v727_v56 }
 0x25a   :  { %v1318_v58 = vpop.f32.mrf.mxu0 }
 0x25b   :  { %v889_v59 = vadd.f32 %v1318_v58, %v1743_v57 }
 0x25c   :  { %v883_v42 = vpop.f32.mrf.mxu0 }
 0x25d   :  { %1014 = vst.msk [vmem:[%s1883_s8 + $0x8] sm:$0xff] %vm1012_vm1, %v889_v59  ;;  %v884_v60 = vadd.f32 %v1743_v57, %v883_v42 }
 0x25e   :  { %v1321_v61 = vpop.f32.mrf.mxu0 }
 0x25f   :  { %1013 = vst.msk [vmem:[%s1883_s8] sm:$0xff] %vm1012_vm1, %v884_v60  ;;  %v899_v62 = vadd.f32 %v1321_v61, %v1743_v57 }
 0x260   :  { %v893_v63 = vpop.f32.mrf.mxu0 }
 0x261   :  { %1016 = vst.msk [vmem:[%s1883_s8 + $0x18] sm:$0xff] %vm1012_vm1, %v899_v62  ;;  %v894_v0 = vadd.f32 %v1743_v57, %v893_v63 }
 0x262   :  { %v1324_v1 = vpop.f32.mrf.mxu0 }
 0x263   :  { %1015 = vst.msk [vmem:[%s1883_s8 + $0x10] sm:$0xff] %vm1012_vm1, %v894_v0  ;;  %v909_v2 = vadd.f32 %v1324_v1, %v1743_v57 }
 0x264   :  { %v903_v3 = vpop.f32.mrf.mxu0 }
 0x265   :  { %1018 = vst.msk [vmem:[%s1883_s8 + $0x28] sm:$0xff] %vm1012_vm1, %v909_v2  ;;  %v904_v4 = vadd.f32 %v1743_v57, %v903_v3 }
 0x266   :  { %v1327_v5 = vpop.f32.mrf.mxu0 }
 0x267   :  { %1017 = vst.msk [vmem:[%s1883_s8 + $0x20] sm:$0xff] %vm1012_vm1, %v904_v4  ;;  %v919_v6 = vadd.f32 %v1327_v5, %v1743_v57 }
 0x268   :  { %v913_v7 = vpop.f32.mrf.mxu0 }
 0x269   :  { %1020 = vst.msk [vmem:[%s1883_s8 + $0x38] sm:$0xff] %vm1012_vm1, %v919_v6  ;;  %v914_v8 = vadd.f32 %v1743_v57, %v913_v7 }
 0x26a   :  { %v1330_v9 = vpop.f32.mrf.mxu0 }
 0x26b   :  { %1019 = vst.msk [vmem:[%s1883_s8 + $0x30] sm:$0xff] %vm1012_vm1, %v914_v8  ;;  %v929_v10 = vadd.f32 %v1330_v9, %v1743_v57 }
 0x26c   :  { %v923_v11 = vpop.f32.mrf.mxu0 }
 0x26d   :  { %1022 = vst.msk [vmem:[%s1883_s8 + $0x48] sm:$0xff] %vm1012_vm1, %v929_v10  ;;  %v924_v12 = vadd.f32 %v1743_v57, %v923_v11 }
 0x26e   :  { %v1333_v13 = vpop.f32.mrf.mxu0 }
 0x26f   :  { %1021 = vst.msk [vmem:[%s1883_s8 + $0x40] sm:$0xff] %vm1012_vm1, %v924_v12  ;;  %v939_v14 = vadd.f32 %v1333_v13, %v1743_v57 }
 0x270   :  { %v933_v15 = vpop.f32.mrf.mxu0 }
 0x271   :  { %1024 = vst.msk [vmem:[%s1883_s8 + $0x58] sm:$0xff] %vm1012_vm1, %v939_v14  ;;  %v934_v16 = vadd.f32 %v1743_v57, %v933_v15 }
 0x272   :  { %v1336_v17 = vpop.f32.mrf.mxu0 }
 0x273   :  { %1023 = vst.msk [vmem:[%s1883_s8 + $0x50] sm:$0xff] %vm1012_vm1, %v934_v16  ;;  %v949_v18 = vadd.f32 %v1336_v17, %v1743_v57 }
 0x274   :  { %v943_v19 = vpop.f32.mrf.mxu0 }
 0x275   :  { %1026 = vst.msk [vmem:[%s1883_s8 + $0x68] sm:$0xff] %vm1012_vm1, %v949_v18  ;;  %v944_v20 = vadd.f32 %v1743_v57, %v943_v19 }
 0x276   :  { %v1339_v21 = vpop.f32.mrf.mxu0 }
 0x277   :  { %1025 = vst.msk [vmem:[%s1883_s8 + $0x60] sm:$0xff] %vm1012_vm1, %v944_v20  ;;  %v959_v22 = vadd.f32 %v1339_v21, %v1743_v57 }
 0x278   :  { %v953_v23 = vpop.f32.mrf.mxu0 }
 0x279   :  { %1028 = vst.msk [vmem:[%s1883_s8 + $0x78] sm:$0xff] %vm1012_vm1, %v959_v22  ;;  %v954_v24 = vadd.f32 %v1743_v57, %v953_v23 }
 0x27a   :  { %v1342_v26 = vpop.f32.mrf.mxu0 }
 0x27b   :  { %1027 = vst.msk [vmem:[%s1883_s8 + $0x70] sm:$0xff] %vm1012_vm1, %v954_v24  ;;  %v969_v27 = vadd.f32 %v1342_v26, %v1743_v57 }
 0x27c   :  { %v963_v28 = vpop.f32.mrf.mxu0 }
 0x27d   :  { %1030 = vst.msk [vmem:[%s1883_s8 + $0x88] sm:$0xff] %vm1012_vm1, %v969_v27  ;;  %v964_v29 = vadd.f32 %v1743_v57, %v963_v28 }
 0x27e   :  { %v1345_v30 = vpop.f32.mrf.mxu0 }
 0x27f   :  { %1029 = vst.msk [vmem:[%s1883_s8 + $0x80] sm:$0xff] %vm1012_vm1, %v964_v29  ;;  %v979_v31 = vadd.f32 %v1345_v30, %v1743_v57 }
 0x280   :  { %v973_v32 = vpop.f32.mrf.mxu0 }
 0x281   :  { %1032 = vst.msk [vmem:[%s1883_s8 + $0x98] sm:$0xff] %vm1012_vm1, %v979_v31  ;;  %v974_v33 = vadd.f32 %v1743_v57, %v973_v32 }
 0x282   :  { %v1348_v34 = vpop.f32.mrf.mxu0 }
 0x283   :  { %1031 = vst.msk [vmem:[%s1883_s8 + $0x90] sm:$0xff] %vm1012_vm1, %v974_v33  ;;  %v989_v35 = vadd.f32 %v1348_v34, %v1743_v57 }
 0x284   :  { %v983_v36 = vpop.f32.mrf.mxu0 }
 0x285   :  { %1034 = vst.msk [vmem:[%s1883_s8 + $0xa8] sm:$0xff] %vm1012_vm1, %v989_v35  ;;  %v984_v37 = vadd.f32 %v1743_v57, %v983_v36 }
 0x286   :  { %v1351_v38 = vpop.f32.mrf.mxu0 }
 0x287   :  { %1033 = vst.msk [vmem:[%s1883_s8 + $0xa0] sm:$0xff] %vm1012_vm1, %v984_v37  ;;  %v999_v39 = vadd.f32 %v1351_v38, %v1743_v57 }
 0x288   :  { %v993_v40 = vpop.f32.mrf.mxu0 }
 0x289   :  { %1036 = vst.msk [vmem:[%s1883_s8 + $0xb8] sm:$0xff] %vm1012_vm1, %v999_v39  ;;  %v994_v41 = vadd.f32 %v1743_v57, %v993_v40 }
 0x28a   :  { %v1354_v43 = vpop.f32.mrf.mxu0 }
 0x28b   :  { %1035 = vst.msk [vmem:[%s1883_s8 + $0xb0] sm:$0xff] %vm1012_vm1, %v994_v41  ;;  %v1009_v25 = vadd.f32 %v1354_v43, %v1743_v57 }
 0x28c   :  { %v1003_v44 = vpop.f32.mrf.mxu0 }
 0x28d   :  { %1038 = vst.msk [vmem:[%s1883_s8 + $0xc8] sm:$0xff] %vm1012_vm1, %v1009_v25  ;;  %v1004_v45 = vadd.f32 %v1743_v57, %v1003_v44 }
 0x28f   :  { %1037 = vst.msk [vmem:[%s1883_s8 + $0xc0] sm:$0xff] %vm1012_vm1, %v1004_v45 }

</bundles_post_ra>
